<compile_context>
chip_gen: v7x
topology: tpu7x:2x2x1
jax: 0.10.0
libtpu: 0.0.40
codegen_flags: <defaults>
</compile_context>

<pallas_src>
import functools

import jax
import jax.numpy as jnp
import numpy as np
from jax.experimental import pallas as pl
from jax.experimental.pallas import tpu as pltpu


def _pad_to(x, m):
    return ((x + m - 1) // m) * m


def _round_math(adj, deg, esum, hv, w_self, w_src, bm, we, w_ih, w_hh, b_gru, *, hidden):
    """One propagation round (shared by the kernel and the matched-precision ref).

    hv: (Np, Hp) f32, columns >= hidden are zero. Matmul operands use adj.dtype
    (bf16 fast path / f32 exact path); accumulation and gate math stay f32.
    Returns the new (Np, hidden) node state.
    """
    H = hidden
    mm = adj.dtype
    f32 = jnp.float32

    # message_funcs[t] per edge + sum over incoming edges, fused into dense algebra.
    nbr = jnp.dot(adj, hv.astype(mm), preferred_element_type=f32)            # (Np, Hp)
    a = jnp.dot((deg * hv).astype(mm), w_self, preferred_element_type=f32)   # (Np, Ap)
    a = a + jnp.dot(nbr.astype(mm), w_src, preferred_element_type=f32)
    a = a + deg * bm + esum * we                                             # in-kernel bias

    # node_update_funcs[t]: torch.nn.GRUCell(2H -> H), gates packed [r|z|gi_n|gh_n].
    g = jnp.dot(a.astype(mm), w_ih, preferred_element_type=f32)              # (Np, Gp)
    g = g + jnp.dot(hv.astype(mm), w_hh, preferred_element_type=f32)
    g = g + b_gru
    r = jax.nn.sigmoid(g[:, 0:H])
    z = jax.nn.sigmoid(g[:, H:2 * H])
    n = jnp.tanh(g[:, 2 * H:3 * H] + r * g[:, 3 * H:4 * H])
    return (1.0 - z) * n + z * hv[:, 0:H]


def _graphprop_kernel(adj_ref, deg_ref, esum_ref, hv0_ref,
                      wself_ref, wsrc_ref, bm_ref, we_ref,
                      wih_ref, whh_ref, bgru_ref,
                      out_ref, hv_sc, *, hidden, num_rounds):
    t = pl.program_id(0)

    @pl.when(t == 0)
    def _():
        hv_sc[...] = hv0_ref[...]          # zero-padded columns stay zero forever

    new_hv = _round_math(
        adj_ref[...], deg_ref[...], esum_ref[...], hv_sc[...],
        wself_ref[...], wsrc_ref[...], bm_ref[...], we_ref[...],
        wih_ref[...], whh_ref[...], bgru_ref[...], hidden=hidden)
    hv_sc[:, 0:hidden] = new_hv            # masked lane store; pad cols untouched

    @pl.when(t == num_rounds - 1)
    def _():
        out_ref[...] = hv_sc[...]


def _pack_operands(hv, src, dst, efeat, params, matmul_dtype):
    """Plain-JAX glue: lane-dense, fusion-packed operands (no zero cross-blocks)."""
    N, H = hv.shape
    T = params["wself"].shape[0]
    Hp = _pad_to(H, 128)          # node-state lane width
    Ap = _pad_to(2 * H, 128)      # message-activation lane width
    Gp = _pad_to(4 * H, 128)      # packed GRU-gate lane width [r|z|gi_n|gh_n]
    Np = _pad_to(N, 8)            # nodes padded to a sublane multiple

    f32 = jnp.float32
    src = src.astype(jnp.int32)
    dst = dst.astype(jnp.int32)

    # Dense in-adjacency (dst, src) with multiplicities, in-degree, edge-feature sums.
    # NOTE: bf16 adj stores multiplicities exactly only up to 256 parallel edges.
    adj = jnp.zeros((Np, Np), f32).at[dst, src].add(1.0)
    deg = jnp.zeros((Np,), f32).at[dst].add(1.0)
    esum = jnp.zeros((Np,), f32).at[dst].add(efeat.astype(f32))
    hv_p = jnp.zeros((Np, Hp), f32).at[:N, :H].set(hv.astype(f32))

    # Message weights, kept as two separate blocks (no concat / cross-zeros).
    w_self = jnp.zeros((T, Hp, Ap), f32).at[:, :H, :2 * H].set(params["wself"])
    w_src = jnp.zeros((T, Hp, Ap), f32).at[:, :H, :2 * H].set(params["wsrc"])
    bm = jnp.zeros((T, 1, Ap), f32).at[:, :, :2 * H].set(params["bm"])
    we = jnp.zeros((T, 1, Ap), f32).at[:, :, :2 * H].set(params["we"])

    # GRU weights: packed gate layout [r | z | gi_n | gh_n], each H wide.
    # torch column order of wih/whh is already [r | z | n].
    wih, whh = params["wih"], params["whh"]          # (T,2H,3H), (T,H,3H)
    w_ih = jnp.zeros((T, Ap, Gp), f32).at[:, :2 * H, :3 * H].set(wih)       # r,z,gi_n
    w_hh = jnp.zeros((T, Hp, Gp), f32)
    w_hh = w_hh.at[:, :H, 0:2 * H].set(whh[:, :, 0:2 * H])                  # r,z (hidden)
    w_hh = w_hh.at[:, :H, 3 * H:4 * H].set(whh[:, :, 2 * H:3 * H])          # gh_n

    bih, bhh = params["bih"], params["bhh"]          # (T,1,3H)
    b_gru = jnp.zeros((T, 1, Gp), f32)
    b_gru = b_gru.at[:, :, 0:2 * H].set(bih[:, :, 0:2 * H] + bhh[:, :, 0:2 * H])
    b_gru = b_gru.at[:, :, 2 * H:3 * H].set(bih[:, :, 2 * H:3 * H])
    b_gru = b_gru.at[:, :, 3 * H:4 * H].set(bhh[:, :, 2 * H:3 * H])

    mm = matmul_dtype
    ops = (adj.astype(mm), deg.reshape(Np, 1), esum.reshape(Np, 1), hv_p,
           w_self.astype(mm), w_src.astype(mm), bm, we,
           w_ih.astype(mm), w_hh.astype(mm), b_gru)
    return ops, (N, H, Np, Hp, Ap, Gp, T)


def graph_prop(hv, src, dst, efeat, params, *, matmul_dtype=jnp.bfloat16):
    """GraphProp.forward: returns updated node features (N, H), float32."""
    if src.shape[0] == 0:      # edge-less graph: module returns with hv untouched
        return hv
    ops, (N, H, Np, Hp, Ap, Gp, T) = _pack_operands(hv, src, dst, efeat, params,
                                                    matmul_dtype)

    # Round-invariant operands: constant block index -> fetched once, stay resident.
    const = lambda shape: pl.BlockSpec(shape, lambda t, _s=len(shape): (0,) * _s)
    # Per-round operands: leading round dim squeezed, double-buffered across rounds.
    per_round = lambda shape: pl.BlockSpec(
        (None,) + shape, lambda t, _s=len(shape): (t,) + (0,) * _s)

    in_specs = [
        const((Np, Np)),        # adj
        const((Np, 1)),         # deg
        const((Np, 1)),         # esum
        const((Np, Hp)),        # hv0
        per_round((Hp, Ap)),    # w_self[t]
        per_round((Hp, Ap)),    # w_src[t]
        per_round((1, Ap)),     # bm[t]
        per_round((1, Ap)),     # we[t]
        per_round((Ap, Gp)),    # w_ih[t]
        per_round((Hp, Gp)),    # w_hh[t]
        per_round((1, Gp)),     # b_gru[t]
    ]
    out_specs = pl.BlockSpec((Np, Hp), lambda t: (0, 0))

    # Explicit VMEM budget (double-buffered blocks + scratch + headroom), capped
    # at v7x's 64 MiB physical per-TC VMEM; generous floor for compiler temps.
    mm_b = np.dtype(matmul_dtype).itemsize
    block_bytes = (Np * Np * mm_b + 2 * Np * 4 + Np * Hp * 4          # adj, deg, esum, hv0
                   + 2 * Hp * Ap * mm_b + 2 * Ap * 4                  # w_self, w_src, bm, we
                   + (Ap + Hp) * Gp * mm_b + Gp * 4                   # w_ih, w_hh, b_gru
                   + Np * Hp * 4)                                     # out
    vmem_limit = int(min(64 << 20, max(4 * block_bytes + (8 << 20), 32 << 20)))

    flops_round = (2 * Np * Np * Hp + 2 * 2 * Np * Hp * Ap
                   + 2 * Np * Ap * Gp + 2 * Np * Hp * Gp)
    bytes_accessed = int(sum(int(np.prod(o.shape)) * o.dtype.itemsize for o in ops)
                         + Np * Hp * 4)
    cost = pl.CostEstimate(flops=int(T * flops_round),
                           transcendentals=int(T * 3 * Np * H),
                           bytes_accessed=bytes_accessed)

    out = pl.pallas_call(
        functools.partial(_graphprop_kernel, hidden=H, num_rounds=T),
        out_shape=jax.ShapeDtypeStruct((Np, Hp), jnp.float32),
        grid_spec=pltpu.PrefetchScalarGridSpec(
            num_scalar_prefetch=0,
            grid=(T,),
            in_specs=in_specs,
            out_specs=out_specs,
            scratch_shapes=[pltpu.VMEM((Np, Hp), jnp.float32)]),
        compiler_params=pltpu.CompilerParams(
            dimension_semantics=("arbitrary",),      # rounds are sequential
            vmem_limit_bytes=vmem_limit),
        cost_estimate=cost,
    )(*ops)
    return out[:N, :H]


def graph_prop_packed_ref(hv, src, dst, efeat, params, *, matmul_dtype=jnp.bfloat16):
    """Matched-precision pure-JAX reference (same packing + same round math)."""
    ops, (N, H, Np, Hp, Ap, Gp, T) = _pack_operands(hv, src, dst, efeat, params,
                                                    matmul_dtype)
    adj, deg, esum, hv_p, w_self, w_src, bm, we, w_ih, w_hh, b_gru = ops
    for t in range(T):
        new = _round_math(adj, deg, esum, hv_p, w_self[t], w_src[t], bm[t], we[t],
                          w_ih[t], w_hh[t], b_gru[t], hidden=H)
        hv_p = hv_p.at[:, :H].set(new)
    return hv_p[:N, :H]


def graph_prop_reference(hv, src, dst, efeat, params):
    """Pure-JAX f32 reference with explicit per-edge messages (DGL semantics)."""
    T = params["wself"].shape[0]
    N, H = hv.shape
    for t in range(T):
        msg_in = jnp.concatenate([hv[dst], hv[src], efeat[:, None]], axis=1)   # (E, 2H+1)
        Wm = jnp.concatenate(
            [params["wself"][t], params["wsrc"][t], params["we"][t]], axis=0)  # (2H+1, 2H)
        msg = msg_in @ Wm + params["bm"][t]                                    # (E, 2H)
        a = jnp.zeros((N, 2 * H), jnp.float32).at[dst].add(msg)
        gi = a @ params["wih"][t] + params["bih"][t][0]
        gh = hv @ params["whh"][t] + params["bhh"][t][0]
        r = jax.nn.sigmoid(gi[:, :H] + gh[:, :H])
        z = jax.nn.sigmoid(gi[:, H:2 * H] + gh[:, H:2 * H])
        n = jnp.tanh(gi[:, 2 * H:] + r * gh[:, 2 * H:])
        hv = (1.0 - z) * n + z * hv
    return hv


def init_params(key, num_prop_rounds, H):
    """Deterministic synthetic init matching torch module shapes (transposed to (in, out))."""
    ks = jax.random.split(key, 6)
    act = 2 * H                               # node_activation_hidden_size
    b_msg = 1.0 / np.sqrt(2 * H + 1)
    b_gru = 1.0 / np.sqrt(H)
    u = lambda k, shape, b: jax.random.uniform(k, shape, jnp.float32, -b, b)
    return {
        # message_funcs[t]: Linear(2H+1 -> 2H), weight^T split into [self | src | edge]
        "wself": u(ks[0], (num_prop_rounds, H, act), b_msg),
        "wsrc":  u(ks[1], (num_prop_rounds, H, act), b_msg),
        "we":    u(ks[2], (num_prop_rounds, 1, act), b_msg),
        "bm":    u(ks[3], (num_prop_rounds, 1, act), b_msg),
        # node_update_funcs[t]: GRUCell(2H -> H); weight_ih^T (2H,3H), weight_hh^T (H,3H)
        "wih":   u(ks[4], (num_prop_rounds, act, 3 * H), b_gru),
        "whh":   u(ks[5], (num_prop_rounds, H, 3 * H), b_gru),
        "bih":   u(jax.random.fold_in(key, 7), (num_prop_rounds, 1, 3 * H), b_gru),
        "bhh":   u(jax.random.fold_in(key, 8), (num_prop_rounds, 1, 3 * H), b_gru),
    }


if __name__ == "__main__":
    key = jax.random.PRNGKey(0)
    N, H, T, E = 16, 32, 2, 24        # nodes, node_hidden_size, num_prop_rounds, edges
    # NOTE: at N=16 every matmul's M dim badly underfills the MXU (16/256 rows);
    # realistic use should batch graphs block-diagonally or tile dst at >=256 rows.

    k_hv, k_src, k_dst, k_e, k_p = jax.random.split(key, 5)
    hv = jax.random.normal(k_hv, (N, H), jnp.float32)        # g.ndata['hv']
    src = jax.random.randint(k_src, (E,), 0, N)              # edge source nodes
    dst = jax.random.randint(k_dst, (E,), 0, N)              # edge destination nodes
    efeat = jax.random.normal(k_e, (E,), jnp.float32)        # g.edata['he'] (scalar/edge)
    params = init_params(k_p, T, H)

    ref = graph_prop_reference(hv, src, dst, efeat, params)

    # 1) exact-semantics check: f32 matmul path vs explicit per-edge reference.
    out_f32 = jax.block_until_ready(
        graph_prop(hv, src, dst, efeat, params, matmul_dtype=jnp.float32))
    assert out_f32.shape == (N, H) and out_f32.dtype == jnp.float32
    np.testing.assert_allclose(np.asarray(out_f32), np.asarray(ref),
                               rtol=1e-4, atol=1e-4)

    # 2) fast path (bf16 MXU operands): validate against matched-precision JAX math.
    out_bf16 = jax.block_until_ready(graph_prop(hv, src, dst, efeat, params))
    mref = graph_prop_packed_ref(hv, src, dst, efeat, params)
    assert out_bf16.shape == (N, H) and out_bf16.dtype == jnp.float32
    np.testing.assert_allclose(np.asarray(out_bf16), np.asarray(mref),
                               rtol=2e-3, atol=2e-3)

    print("KERNEL_OK")
</pallas_src>

<mosaic_0001>
module attributes {stable_mosaic.version = 11 : i64} {
  func.func @_graphprop_kernel(%arg0: i32, %arg1: memref<16x16xf32, #tpu.memory_space<vmem>>, %arg2: memref<16x1xf32, #tpu.memory_space<vmem>>, %arg3: memref<16x1xf32, #tpu.memory_space<vmem>>, %arg4: memref<16x128xf32, #tpu.memory_space<vmem>>, %arg5: memref<1x128x128xf32, #tpu.memory_space<vmem>>, %arg6: memref<1x128x128xf32, #tpu.memory_space<vmem>>, %arg7: memref<1x1x128xf32, #tpu.memory_space<vmem>>, %arg8: memref<1x1x128xf32, #tpu.memory_space<vmem>>, %arg9: memref<1x128x128xf32, #tpu.memory_space<vmem>>, %arg10: memref<1x128x128xf32, #tpu.memory_space<vmem>>, %arg11: memref<1x1x128xf32, #tpu.memory_space<vmem>>, %arg12: memref<16x128xf32, #tpu.memory_space<vmem>>, %arg13: memref<16x128xf32, #tpu.memory_space<vmem>>) attributes {dimension_semantics = [#tpu.dimension_semantics<arbitrary>], iteration_bounds = array<i64: 2>, scalar_prefetch = 0 : i64, scratch_operands = 1 : i64, tpu.core_type = #tpu.core_type<tc>, window_params = [{pipeline_mode = #tpu.pipeline_mode<synchronous>, transform_indices = @transform_0, window_bounds = array<i64: 16, 16>}, {pipeline_mode = #tpu.pipeline_mode<synchronous>, transform_indices = @transform_1, window_bounds = array<i64: 16, 1>}, {pipeline_mode = #tpu.pipeline_mode<synchronous>, transform_indices = @transform_2, window_bounds = array<i64: 16, 1>}, {pipeline_mode = #tpu.pipeline_mode<synchronous>, transform_indices = @transform_3, window_bounds = array<i64: 16, 128>}, {transform_indices = @transform_4, window_bounds = array<i64: 1, 128, 128>}, {transform_indices = @transform_5, window_bounds = array<i64: 1, 128, 128>}, {transform_indices = @transform_6, window_bounds = array<i64: 1, 1, 128>}, {transform_indices = @transform_7, window_bounds = array<i64: 1, 1, 128>}, {transform_indices = @transform_8, window_bounds = array<i64: 1, 128, 128>}, {transform_indices = @transform_9, window_bounds = array<i64: 1, 128, 128>}, {transform_indices = @transform_10, window_bounds = array<i64: 1, 1, 128>}, {pipeline_mode = #tpu.pipeline_mode<synchronous>, transform_indices = @transform_11, window_bounds = array<i64: 16, 128>}]} {
    %c0_i32 = arith.constant 0 : i32
    %0 = arith.cmpi eq, %arg0, %c0_i32 : i32
    %1 = arith.extui %0 : i1 to i32
    %c0_i32_0 = arith.constant 0 : i32
    %2 = arith.cmpi ne, %1, %c0_i32_0 : i32
    scf.if %2 {
      %c0_39 = arith.constant 0 : index
      %c0_40 = arith.constant 0 : index
      %67 = vector.load %arg4[%c0_39, %c0_40] : memref<16x128xf32, #tpu.memory_space<vmem>>, vector<16x128xf32>
      %c0_41 = arith.constant 0 : index
      %c0_42 = arith.constant 0 : index
      %68 = vector.load %arg13[%c0_41, %c0_42] : memref<16x128xf32, #tpu.memory_space<vmem>>, vector<16x128xf32>
      tpu.vector_store %arg13[%c0_41, %c0_42], %67 {strides = array<i32>} : memref<16x128xf32, #tpu.memory_space<vmem>>, vector<16x128xf32>,
    } else {
    }
    %c0 = arith.constant 0 : index
    %c0_1 = arith.constant 0 : index
    %3 = vector.load %arg1[%c0, %c0_1] : memref<16x16xf32, #tpu.memory_space<vmem>>, vector<16x16xf32>
    %c0_2 = arith.constant 0 : index
    %c0_3 = arith.constant 0 : index
    %4 = vector.load %arg2[%c0_2, %c0_3] : memref<16x1xf32, #tpu.memory_space<vmem>>, vector<16x1xf32>
    %c0_4 = arith.constant 0 : index
    %c0_5 = arith.constant 0 : index
    %5 = vector.load %arg3[%c0_4, %c0_5] : memref<16x1xf32, #tpu.memory_space<vmem>>, vector<16x1xf32>
    %c0_6 = arith.constant 0 : index
    %c0_7 = arith.constant 0 : index
    %6 = vector.load %arg13[%c0_6, %c0_7] : memref<16x128xf32, #tpu.memory_space<vmem>>, vector<16x128xf32>
    %c0_8 = arith.constant 0 : index
    %c0_9 = arith.constant 0 : index
    %c0_10 = arith.constant 0 : index
    %7 = vector.load %arg5[%c0_8, %c0_9, %c0_10] : memref<1x128x128xf32, #tpu.memory_space<vmem>>, vector<1x128x128xf32>
    %8 = vector.shape_cast %7 : vector<1x128x128xf32> to vector<128x128xf32>
    %c0_11 = arith.constant 0 : index
    %c0_12 = arith.constant 0 : index
    %c0_13 = arith.constant 0 : index
    %9 = vector.load %arg6[%c0_11, %c0_12, %c0_13] : memref<1x128x128xf32, #tpu.memory_space<vmem>>, vector<1x128x128xf32>
    %10 = vector.shape_cast %9 : vector<1x128x128xf32> to vector<128x128xf32>
    %c0_14 = arith.constant 0 : index
    %c0_15 = arith.constant 0 : index
    %c0_16 = arith.constant 0 : index
    %11 = vector.load %arg7[%c0_14, %c0_15, %c0_16] : memref<1x1x128xf32, #tpu.memory_space<vmem>>, vector<1x1x128xf32>
    %12 = vector.shape_cast %11 : vector<1x1x128xf32> to vector<1x128xf32>
    %c0_17 = arith.constant 0 : index
    %c0_18 = arith.constant 0 : index
    %c0_19 = arith.constant 0 : index
    %13 = vector.load %arg8[%c0_17, %c0_18, %c0_19] : memref<1x1x128xf32, #tpu.memory_space<vmem>>, vector<1x1x128xf32>
    %14 = vector.shape_cast %13 : vector<1x1x128xf32> to vector<1x128xf32>
    %c0_20 = arith.constant 0 : index
    %c0_21 = arith.constant 0 : index
    %c0_22 = arith.constant 0 : index
    %15 = vector.load %arg9[%c0_20, %c0_21, %c0_22] : memref<1x128x128xf32, #tpu.memory_space<vmem>>, vector<1x128x128xf32>
    %16 = vector.shape_cast %15 : vector<1x128x128xf32> to vector<128x128xf32>
    %c0_23 = arith.constant 0 : index
    %c0_24 = arith.constant 0 : index
    %c0_25 = arith.constant 0 : index
    %17 = vector.load %arg10[%c0_23, %c0_24, %c0_25] : memref<1x128x128xf32, #tpu.memory_space<vmem>>, vector<1x128x128xf32>
    %18 = vector.shape_cast %17 : vector<1x128x128xf32> to vector<128x128xf32>
    %c0_26 = arith.constant 0 : index
    %c0_27 = arith.constant 0 : index
    %c0_28 = arith.constant 0 : index
    %19 = vector.load %arg11[%c0_26, %c0_27, %c0_28] : memref<1x1x128xf32, #tpu.memory_space<vmem>>, vector<1x1x128xf32>
    %20 = vector.shape_cast %19 : vector<1x1x128xf32> to vector<1x128xf32>
    %cst = arith.constant dense<0.000000e+00> : vector<16x128xf32>
    %21 = tpu.matmul %3, %6, %cst {dimension_numbers = #tpu.dot_dimension_numbers<[1], [0], [0], [1], [0, 0, 1, 1], [], []>} : vector<16x16xf32>, vector<16x128xf32>, vector<16x128xf32> -> vector<16x128xf32>
    %22 = vector.broadcast %4 : vector<16x1xf32> to vector<16x128xf32>
    %23 = arith.mulf %22, %6 : vector<16x128xf32>
    %cst_29 = arith.constant dense<0.000000e+00> : vector<16x128xf32>
    %24 = tpu.matmul %23, %8, %cst_29 {dimension_numbers = #tpu.dot_dimension_numbers<[1], [0], [0], [1], [0, 0, 1, 1], [], []>} : vector<16x128xf32>, vector<128x128xf32>, vector<16x128xf32> -> vector<16x128xf32>
    %cst_30 = arith.constant dense<0.000000e+00> : vector<16x128xf32>
    %25 = tpu.matmul %21, %10, %cst_30 {dimension_numbers = #tpu.dot_dimension_numbers<[1], [0], [0], [1], [0, 0, 1, 1], [], []>} : vector<16x128xf32>, vector<128x128xf32>, vector<16x128xf32> -> vector<16x128xf32>
    %26 = arith.addf %24, %25 : vector<16x128xf32>
    %27 = vector.broadcast %4 : vector<16x1xf32> to vector<16x128xf32>
    %28 = vector.broadcast %12 : vector<1x128xf32> to vector<16x128xf32>
    %29 = arith.mulf %27, %28 : vector<16x128xf32>
    %30 = arith.addf %26, %29 : vector<16x128xf32>
    %31 = vector.broadcast %5 : vector<16x1xf32> to vector<16x128xf32>
    %32 = vector.broadcast %14 : vector<1x128xf32> to vector<16x128xf32>
    %33 = arith.mulf %31, %32 : vector<16x128xf32>
    %34 = arith.addf %30, %33 : vector<16x128xf32>
    %cst_31 = arith.constant dense<0.000000e+00> : vector<16x128xf32>
    %35 = tpu.matmul %34, %16, %cst_31 {dimension_numbers = #tpu.dot_dimension_numbers<[1], [0], [0], [1], [0, 0, 1, 1], [], []>} : vector<16x128xf32>, vector<128x128xf32>, vector<16x128xf32> -> vector<16x128xf32>
    %cst_32 = arith.constant dense<0.000000e+00> : vector<16x128xf32>
    %36 = tpu.matmul %6, %18, %cst_32 {dimension_numbers = #tpu.dot_dimension_numbers<[1], [0], [0], [1], [0, 0, 1, 1], [], []>} : vector<16x128xf32>, vector<128x128xf32>, vector<16x128xf32> -> vector<16x128xf32>
    %37 = arith.addf %35, %36 : vector<16x128xf32>
    %38 = vector.broadcast %20 : vector<1x128xf32> to vector<16x128xf32>
    %39 = arith.addf %37, %38 : vector<16x128xf32>
    %40 = vector.extract_strided_slice %39 {offsets = [0, 0], sizes = [16, 32], strides = [1, 1]} : vector<16x128xf32> to vector<16x32xf32>
    %41 = arith.negf %40 : vector<16x32xf32>
    %42 = math.exp %41 : vector<16x32xf32>
    %cst_33 = arith.constant 1.000000e+00 : f32
    %43 = vector.broadcast %cst_33 : f32 to vector<16x32xf32>
    %44 = arith.addf %43, %42 : vector<16x32xf32>
    %45 = arith.divf %43, %44 : vector<16x32xf32>
    %46 = vector.extract_strided_slice %39 {offsets = [0, 32], sizes = [16, 32], strides = [1, 1]} : vector<16x128xf32> to vector<16x32xf32>
    %47 = arith.negf %46 : vector<16x32xf32>
    %48 = math.exp %47 : vector<16x32xf32>
    %cst_34 = arith.constant 1.000000e+00 : f32
    %49 = vector.broadcast %cst_34 : f32 to vector<16x32xf32>
    %50 = arith.addf %49, %48 : vector<16x32xf32>
    %51 = arith.divf %49, %50 : vector<16x32xf32>
    %52 = vector.extract_strided_slice %39 {offsets = [0, 64], sizes = [16, 32], strides = [1, 1]} : vector<16x128xf32> to vector<16x32xf32>
    %53 = vector.extract_strided_slice %39 {offsets = [0, 96], sizes = [16, 32], strides = [1, 1]} : vector<16x128xf32> to vector<16x32xf32>
    %54 = arith.mulf %45, %53 : vector<16x32xf32>
    %55 = arith.addf %52, %54 : vector<16x32xf32>
    %56 = math.tanh %55 : vector<16x32xf32>
    %cst_35 = arith.constant 1.000000e+00 : f32
    %57 = vector.broadcast %cst_35 : f32 to vector<16x32xf32>
    %58 = arith.subf %57, %51 : vector<16x32xf32>
    %59 = arith.mulf %58, %56 : vector<16x32xf32>
    %60 = vector.extract_strided_slice %6 {offsets = [0, 0], sizes = [16, 32], strides = [1, 1]} : vector<16x128xf32> to vector<16x32xf32>
    %61 = arith.mulf %51, %60 : vector<16x32xf32>
    %62 = arith.addf %59, %61 : vector<16x32xf32>
    %c0_36 = arith.constant 0 : index
    %c0_37 = arith.constant 0 : index
    %63 = vector.load %arg13[%c0_36, %c0_37] : memref<16x128xf32, #tpu.memory_space<vmem>>, vector<16x32xf32>
    tpu.vector_store %arg13[%c0_36, %c0_37], %62 {strides = array<i32>} : memref<16x128xf32, #tpu.memory_space<vmem>>, vector<16x32xf32>,
    %c1_i32 = arith.constant 1 : i32
    %64 = arith.cmpi eq, %arg0, %c1_i32 : i32
    %65 = arith.extui %64 : i1 to i32
    %c0_i32_38 = arith.constant 0 : i32
    %66 = arith.cmpi ne, %65, %c0_i32_38 : i32
    scf.if %66 {
      %c0_39 = arith.constant 0 : index
      %c0_40 = arith.constant 0 : index
      %67 = vector.load %arg13[%c0_39, %c0_40] : memref<16x128xf32, #tpu.memory_space<vmem>>, vector<16x128xf32>
      %c0_41 = arith.constant 0 : index
      %c0_42 = arith.constant 0 : index
      %68 = vector.load %arg12[%c0_41, %c0_42] : memref<16x128xf32, #tpu.memory_space<vmem>>, vector<16x128xf32>
      tpu.vector_store %arg12[%c0_41, %c0_42], %67 {strides = array<i32>} : memref<16x128xf32, #tpu.memory_space<vmem>>, vector<16x128xf32>,
    } else {
    }
    return
  }
  func.func @transform_0(%arg0: i32) -> (i32, i32) {
    %c0_i32 = arith.constant 0 : i32
    %c0_i32_0 = arith.constant 0 : i32
    %c0_i32_1 = arith.constant 0 : i32
    return %c0_i32, %c0_i32_0 : i32, i32
  }
  func.func @transform_1(%arg0: i32) -> (i32, i32) {
    %c0_i32 = arith.constant 0 : i32
    %c0_i32_0 = arith.constant 0 : i32
    %c0_i32_1 = arith.constant 0 : i32
    return %c0_i32, %c0_i32_0 : i32, i32
  }
  func.func @transform_2(%arg0: i32) -> (i32, i32) {
    %c0_i32 = arith.constant 0 : i32
    %c0_i32_0 = arith.constant 0 : i32
    %c0_i32_1 = arith.constant 0 : i32
    return %c0_i32, %c0_i32_0 : i32, i32
  }
  func.func @transform_3(%arg0: i32) -> (i32, i32) {
    %c0_i32 = arith.constant 0 : i32
    %c0_i32_0 = arith.constant 0 : i32
    %c0_i32_1 = arith.constant 0 : i32
    return %c0_i32, %c0_i32_0 : i32, i32
  }
  func.func @transform_4(%arg0: i32) -> (i32, i32, i32) {
    %c0_i32 = arith.constant 0 : i32
    %c0_i32_0 = arith.constant 0 : i32
    %c0_i32_1 = arith.constant 0 : i32
    return %arg0, %c0_i32, %c0_i32_0 : i32, i32, i32
  }
  func.func @transform_5(%arg0: i32) -> (i32, i32, i32) {
    %c0_i32 = arith.constant 0 : i32
    %c0_i32_0 = arith.constant 0 : i32
    %c0_i32_1 = arith.constant 0 : i32
    return %arg0, %c0_i32, %c0_i32_0 : i32, i32, i32
  }
  func.func @transform_6(%arg0: i32) -> (i32, i32, i32) {
    %c0_i32 = arith.constant 0 : i32
    %c0_i32_0 = arith.constant 0 : i32
    %c0_i32_1 = arith.constant 0 : i32
    return %arg0, %c0_i32, %c0_i32_0 : i32, i32, i32
  }
  func.func @transform_7(%arg0: i32) -> (i32, i32, i32) {
    %c0_i32 = arith.constant 0 : i32
    %c0_i32_0 = arith.constant 0 : i32
    %c0_i32_1 = arith.constant 0 : i32
    return %arg0, %c0_i32, %c0_i32_0 : i32, i32, i32
  }
  func.func @transform_8(%arg0: i32) -> (i32, i32, i32) {
    %c0_i32 = arith.constant 0 : i32
    %c0_i32_0 = arith.constant 0 : i32
    %c0_i32_1 = arith.constant 0 : i32
    return %arg0, %c0_i32, %c0_i32_0 : i32, i32, i32
  }
  func.func @transform_9(%arg0: i32) -> (i32, i32, i32) {
    %c0_i32 = arith.constant 0 : i32
    %c0_i32_0 = arith.constant 0 : i32
    %c0_i32_1 = arith.constant 0 : i32
    return %arg0, %c0_i32, %c0_i32_0 : i32, i32, i32
  }
  func.func @transform_10(%arg0: i32) -> (i32, i32, i32) {
    %c0_i32 = arith.constant 0 : i32
    %c0_i32_0 = arith.constant 0 : i32
    %c0_i32_1 = arith.constant 0 : i32
    return %arg0, %c0_i32, %c0_i32_0 : i32, i32, i32
  }
  func.func @transform_11(%arg0: i32) -> (i32, i32) {
    %c0_i32 = arith.constant 0 : i32
    %c0_i32_0 = arith.constant 0 : i32
    %c0_i32_1 = arith.constant 0 : i32
    return %c0_i32, %c0_i32_0 : i32, i32
  }
}

</mosaic_0001>

<bundles_post_ra>
// kernel: tpu_custom_call.1
= control target key start
LH: loop header
LB: loop body
LE: loop exit
PB: predicated region body
PF: predicated region fallthrough
CT: control target
= control target key end

     0   :  { %s2457_s0 = inlined_call_operand.vmem [shape: f32[16,16], index: 0, kind: input, shape index: {}]   ;;  %s2458_s1 = inlined_call_operand.vmem [shape: f32[16,1], index: 1, kind: input, shape index: {}]   ;;  %s2459_s2 = inlined_call_operand.vmem [shape: f32[16,1], index: 2, kind: input, shape index: {}]   ;;  %s2460_s3 = inlined_call_operand.vmem [shape: f32[16,128], index: 3, kind: input, shape index: {}]   ;;  %s2461_s4 = inlined_call_operand.hbm [shape: f32[2,128,128], index: 4, kind: input, shape index: {}]   ;;  %s2462_s5 = inlined_call_operand.hbm [shape: f32[2,128,128], index: 5, kind: input, shape index: {}]   ;;  %s2463_s6 = inlined_call_operand.vmem [shape: f32[2,1,128], index: 6, kind: input, shape index: {}]   ;;  %s2464_s7 = inlined_call_operand.vmem [shape: f32[2,1,128], index: 7, kind: input, shape index: {}]   ;;  %s2465_s8 = inlined_call_operand.hbm [shape: f32[2,128,128], index: 8, kind: input, shape index: {}]   ;;  %s2466_s9 = inlined_call_operand.hbm [shape: f32[2,128,128], index: 9, kind: input, shape index: {}]   ;;  %s2467_s10 = inlined_call_operand.vmem [shape: f32[2,1,128], index: 10, kind: input, shape index: {}]   ;;  %s2468_s11 = inlined_call_operand.hbm [shape: f32[16,128], index: 11, kind: output, shape index: {}]  }
   0x1   :  { %2480 = sst [smem:[#allocation19_spill]] %s2458_s1 }
   0x2   :  { %2481 = sst [smem:[#allocation20_spill]] %s2459_s2 }
   0x3   :  { %2482 = sst [smem:[#allocation21_spill]] %s2461_s4 }
   0x4   :  { %2483 = sst [smem:[#allocation22_spill]] %s2462_s5 }
   0x5   :  { %2484 = sst [smem:[#allocation23_spill]] %s2468_s11 }
   0x6   :  { %16 = vsyncpa [#allocation4], 0 }
   0x7   :  { %18 = vsyncpa [#allocation4 + $0x1], 0 }
   0x8   :  { %19 = vsyncpa [#allocation7], 0 }
   0x9   :  { %21 = vsyncpa [#allocation7 + $0x1], 0 }
   0xa   :  { %22 = vsyncpa [#allocation10], 0 }
   0xb   :  { %24 = vsyncpa [#allocation10 + $0x1], 0 }
   0xc   :  { %25 = vsyncpa [#allocation5], 0  ;;  %s2042_s17 = smov 0   ;;  %s2044_s18 = smov 0  }
   0xd   :  { %s2046_s19 = smov 0   ;;  %s2048_s20 = smov 0  }
   0xe LB: > { %2485 = sst [smem:[#allocation16_spill]] %s1963_s19  ;;  %s2061_s21 = sadd.s32 4294967295, %s1967_s20   ;;  %s1967_s20 = sphi %s2048_s20, %s2503_s20   ;;  %s1963_s19 = sphi %s2046_s19, %s2505_s19   ;;  %s1959_s18 = sphi %s2044_s18, %s2507_s18   ;;  %s1955_s17 = sphi %s2042_s17, %s2506_s17  }
   0xf   : > { %s2064_s22 = sadd.s32 1, %s1967_s20   ;;  %s122_s24 = sadd.s32 1, %s1963_s19 }
  0x10   : > { %2486 = sst [smem:[#allocation17_spill]] %s2064_s22  ;;  %s119_s23 = ssub.s32 %s1967_s20, %s2064_s22 }
  0x11   : > { %p120_p0 = scmp.eq.s32.totalorder %s119_s23, 0  ;;  %p129_p1 = scmp.ne.s32.totalorder %s1963_s19, %s1959_s18 }
  0x12   : > { %p130_p2 = scmp.eq.s32.totalorder %s1967_s20, 0  ;;  %p135_p3 = scmp.ne.s32.totalorder %s1959_s18, %s1955_s17 }
  0x13   : > { %s2074_s25 = scalar_select %p120_p0, %s1963_s19, %s122_s24  }
  0x14   : > { %p131_p4 = por %p130_p2, %p129_p1  ;;  %p136_p5 = scmp.eq.s32.totalorder %s2061_s21, 0 }
  0x15   : > { %2487 = sst [smem:[#allocation18_spill]] %s2074_s25  ;;  %p1717_p6 = scmp.lt.s32.totalorder %s1967_s20, 2 }
  0x16   : > { %p2078_p7 = por %p136_p5, %p135_p3  ;;  %s2083_s27 = sand.u32 1, %s1963_s19  }
  0x17   : > { %s2086_s28 = sshll.u32 %s2083_s27, 7  ;;  %s2089_s29 = sshll.u32 %s1967_s20, 11 }
  0x18   : > { %s2488_s26 = scalar_select %p2078_p7, 1, 0 }
  0x19   : > { %p2091_p8 = pnand %p1717_p6, %p131_p4  ;;  %s369_s12 = sand.u32 1, %s1967_s20  }
  0x1a   : > { %s2490_s5 = sld [smem:[#allocation22_spill]]  ;;  %s373_s16 = scalar_lea.vmem [#allocation6], %s2086_s28 }
  0x1b   : > { %s380_s17 = sshll.u32 %s373_s16, 4  ;;  %s2107_s23 = scalar_lea.sflag [#allocation7], %s369_s12  ;;  %s2104_s17 = int_to_ptr.vmem [resolvable:$true] %s380_s17 }
  0x1c   : > { %p2113_p12 = pneg %p2091_p8 }
  0x20   : > { %s2100_s15 = scalar_lea.hbm %s2490_s5, %s2089_s29  ;;  %s1780_s16 = scalar_lea.hbm %s2490_s5, 4096 }
  0x21   : > { %s1775_s24 = scalar_lea.hbm %s2100_s15, 2048  ;;  %p1781_p1 = scmp.lt.u32.totalorder %s2100_s15, %s2490_s5 }
  0x22   : > { %p1776_p11 = scmp.ne.s32.totalorder %s2100_s15, %s1775_s24  ;;  %p1782_p2 = scmp.lt.u32.totalorder %s1780_s16, %s1775_s24 }
  0x23   : > { %p1784_p4 = scmp.lt.u32.totalorder %s1775_s24, %s2100_s15 }
  0x24   : > { %p1778_p13 = pnand %p2113_p12, %p1776_p11  ;;  %p1783_p3 = por %p1782_p2, %p1781_p1 }
  0x26   : > { %p1779_p0 = pneg %p1778_p13  ;;  %p1785_p5 = por %p1784_p4, %p1783_p3 }
  0x28   : > { %p1786_p6 = pnand %p1785_p5, %p1779_p0 }
  0x2a   : > { %1789 = shalt.err (!%p1786_p6)
}
  0x2b   : > { %s1790_s12 = scalar_lea.vmem %s2104_s17, 2048  ;;  %s1969_s13 = smov [#allocation6]  }
  0x2c   : > { %p1791_p11 = scmp.ne.s32.totalorder %s2104_s17, %s1790_s12  ;;  %s1795_s14 = sshll.u32 %s1969_s13, 4  ;;  %s1796_s14 = int_to_ptr.vmem [resolvable:$false] %s1795_s14 }
  0x2d   : > { %s1797_s19 = scalar_lea.vmem %s1796_s14, 4096  ;;  %p1798_p10 = scmp.lt.s32.totalorder %s2104_s17, %s1796_s14 }
  0x2e   : > { %p1793_p13 = pnand %p1791_p11, %p2113_p12  ;;  %p1799_p7 = scmp.lt.s32.totalorder %s1797_s19, %s1790_s12 }
  0x30   : > { %p1794_p9 = pneg %p1793_p13  ;;  %p1800_p1 = por %p1799_p7, %p1798_p10 }
  0x32   : > { %p1801_p2 = pnand %p1800_p1, %p1794_p9 }
  0x34   : > { %1804 = shalt.err (!%p1801_p2)
}
  0x35   : > { %s2473_s22 = smov 128   ;;  %s2475_s24 = smov 8  }
  0x36   : > { %1710 = dma.hbm_to_vmem [thread:$0]  (!%p2091_p8), %s2100_s15, 2048, %s2104_s17, %s2107_s23, %s2473_s22, %s2473_s22, %s2475_s24  }
  0x37   : > { %p2492_p7 = scmp.lt.s32.totalorder %s1967_s20, 3  ;;  %p2493_p9 = scmp.ge.s32.totalorder %s1967_s20, 1 }
  0x38   : > { %s2495_s4 = sld [smem:[#allocation21_spill]]  ;;  %s352_s19 = scalar_lea.vmem [#allocation3], %s2086_s28 }
  0x39   : > { %p2144_p10 = pnand %p2493_p9, %p2492_p7  ;;  %s359_s5 = sshll.u32 %s352_s19, 4  ;;  %s2155_s5 = int_to_ptr.vmem [resolvable:$true] %s359_s5 }
  0x3a   : > { %s2161_s20 = scalar_lea.hbm %s2465_s8, %s2089_s29  ;;  %s349_s22 = scalar_lea.sflag [#allocation4], %s2083_s27 }
  0x3b   : > { %s2494_s16 = scalar_select %p2144_p10, 1, 0 }
  0x3e   : > { %s2152_s14 = scalar_lea.hbm %s2495_s4, %s2089_s29  ;;  %s1810_s11 = scalar_lea.hbm %s2495_s4, 4096 }
  0x3f   : > { %s1805_s24 = scalar_lea.hbm %s2152_s14, 2048  ;;  %p1811_p5 = scmp.lt.u32.totalorder %s2152_s14, %s2495_s4 }
  0x40   : > { %p1806_p0 = scmp.ne.s32.totalorder %s2152_s14, %s1805_s24  ;;  %p1812_p6 = scmp.lt.u32.totalorder %s1810_s11, %s1805_s24 }
  0x41   : > { %p1814_p13 = scmp.lt.u32.totalorder %s1805_s24, %s2152_s14 }
  0x42   : > { %p1808_p3 = pnand %p1806_p0, %p2113_p12  ;;  %p1813_p11 = por %p1812_p6, %p1811_p5 }
  0x44   : > { %p1809_p4 = pneg %p1808_p3  ;;  %p1815_p1 = por %p1814_p13, %p1813_p11 }
  0x46   : > { %p1816_p2 = pnand %p1815_p1, %p1809_p4 }
  0x48   : > { %1819 = shalt.err (!%p1816_p2)
}
  0x49   : > { %s1820_s19 = scalar_lea.vmem %s2155_s5, 2048  ;;  %s1972_s15 = smov [#allocation3]  }
  0x4a   : > { %p1821_p7 = scmp.ne.s32.totalorder %s2155_s5, %s1820_s19  ;;  %s1825_s17 = sshll.u32 %s1972_s15, 4  ;;  %s1826_s17 = int_to_ptr.vmem [resolvable:$false] %s1825_s17 }
  0x4b   : > { %s1827_s1 = scalar_lea.vmem %s1826_s17, 4096  ;;  %p1828_p3 = scmp.lt.s32.totalorder %s2155_s5, %s1826_s17 }
  0x4c   : > { %p1823_p9 = pnand %p1821_p7, %p2113_p12  ;;  %p1829_p10 = scmp.lt.s32.totalorder %s1827_s1, %s1820_s19 }
  0x4e   : > { %p1824_p0 = pneg %p1823_p9  ;;  %p1830_p5 = por %p1829_p10, %p1828_p3 }
  0x50   : > { %p1831_p6 = pnand %p1830_p5, %p1824_p0 }
  0x52   : > { %1834 = shalt.err (!%p1831_p6)
}
  0x53   : > { %s2496_s2 = smov 8   ;;  %s2497_s11 = smov 128  }
  0x54   : > { %1707 = dma.hbm_to_vmem [thread:$0]  (!%p2091_p8), %s2152_s14, 2048, %s2155_s5, %s349_s22, %s2497_s11, %s2497_s11, %s2496_s2  }
  0x55   : > { %s406_s24 = scalar_lea.vmem [#allocation8], %s2086_s28  ;;  %s1835_s13 = scalar_lea.hbm %s2161_s20, 2048 }
  0x56   : > { %s413_s12 = sshll.u32 %s406_s24, 4  ;;  %p1836_p10 = scmp.ne.s32.totalorder %s2161_s20, %s1835_s13  ;;  %s2191_s12 = int_to_ptr.vmem [resolvable:$true] %s413_s12 }
  0x57   : > { %s1840_s17 = scalar_lea.hbm %s2465_s8, 4096  ;;  %p1841_p13 = scmp.lt.u32.totalorder %s2161_s20, %s2465_s8 }
  0x58   : > { %p1838_p4 = pnand %p1836_p10, %p2113_p12  ;;  %p1842_p1 = scmp.lt.u32.totalorder %s1840_s17, %s1835_s13 }
  0x59   : > { %p1844_p7 = scmp.lt.u32.totalorder %s1835_s13, %s2161_s20 }
  0x5a   : > { %p1839_p11 = pneg %p1838_p4  ;;  %p1843_p2 = por %p1842_p1, %p1841_p13 }
  0x5c   : > { %p1845_p9 = por %p1844_p7, %p1843_p2 }
  0x5e   : > { %p1846_p0 = pnand %p1845_p9, %p1839_p11 }
  0x60   : > { %1849 = shalt.err (!%p1846_p0)
}
  0x61   : > { %s1850_s5 = scalar_lea.vmem %s2191_s12, 2048  ;;  %s1973_s22 = smov [#allocation8]  }
  0x62   : > { %p1851_p3 = scmp.ne.s32.totalorder %s2191_s12, %s1850_s5  ;;  %s1855_s14 = sshll.u32 %s1973_s22, 4  ;;  %s1856_s14 = int_to_ptr.vmem [resolvable:$false] %s1855_s14 }
  0x63   : > { %s1857_s4 = scalar_lea.vmem %s1856_s14, 4096  ;;  %p1858_p10 = scmp.lt.s32.totalorder %s2191_s12, %s1856_s14 }
  0x64   : > { %p1853_p5 = pnand %p1851_p3, %p2113_p12  ;;  %p1859_p4 = scmp.lt.s32.totalorder %s1857_s4, %s1850_s5 }
  0x66   : > { %p1854_p6 = pneg %p1853_p5  ;;  %p1860_p13 = por %p1859_p4, %p1858_p10 }
  0x68   : > { %p1861_p1 = pnand %p1860_p13, %p1854_p6 }
  0x6a   : > { %1864 = shalt.err (!%p1861_p1)
}
  0x6b   : > { %1713 = dma.hbm_to_vmem [thread:$0]  (!%p2091_p8), %s2161_s20, 2048, %s2191_s12, %s2107_s23, %s2497_s11, %s2497_s11, %s2496_s2  }
  0x6c   : > { %s2222_s19 = scalar_lea.hbm %s2466_s9, %s2089_s29  ;;  %s427_s15 = scalar_lea.vmem [#allocation9], %s2086_s28 }
  0x6d   : > { %s434_s17 = sshll.u32 %s427_s15, 4  ;;  %s424_s1 = scalar_lea.sflag [#allocation10], %s2083_s27  ;;  %s2225_s17 = int_to_ptr.vmem [resolvable:$true] %s434_s17 }
  0x6e   : > { %s1865_s5 = scalar_lea.hbm %s2222_s19, 2048  ;;  %s1870_s12 = scalar_lea.hbm %s2466_s9, 4096 }
  0x6f   : > { %p1866_p11 = scmp.ne.s32.totalorder %s2222_s19, %s1865_s5  ;;  %p1871_p9 = scmp.lt.u32.totalorder %s2222_s19, %s2466_s9 }
  0x70   : > { %p1872_p0 = scmp.lt.u32.totalorder %s1870_s12, %s1865_s5  ;;  %p1874_p5 = scmp.lt.u32.totalorder %s1865_s5, %s2222_s19 }
  0x71   : > { %p1868_p2 = pnand %p1866_p11, %p2113_p12 }
  0x72   : > { %p1873_p3 = por %p1872_p0, %p1871_p9 }
  0x73   : > { %p1869_p7 = pneg %p1868_p2 }
  0x74   : > { %p1875_p6 = por %p1874_p5, %p1873_p3 }
  0x76   : > { %p1876_p10 = pnand %p1875_p6, %p1869_p7 }
  0x78   : > { %1879 = shalt.err (!%p1876_p10)
}
  0x79   : > { %s1880_s28 = scalar_lea.vmem %s2225_s17, 2048  ;;  %s1974_s14 = smov [#allocation9]  }
  0x7a   : > { %p1881_p4 = scmp.ne.s32.totalorder %s2225_s17, %s1880_s28  ;;  %s1885_s4 = sshll.u32 %s1974_s14, 4  ;;  %s1886_s4 = int_to_ptr.vmem [resolvable:$false] %s1885_s4 }
  0x7b   : > { %s1887_s24 = scalar_lea.vmem %s1886_s4, 4096  ;;  %p1888_p11 = scmp.lt.s32.totalorder %s2225_s17, %s1886_s4 }
  0x7c   : > { %p1883_p13 = pnand %p1881_p4, %p2113_p12  ;;  %p1889_p2 = scmp.lt.s32.totalorder %s1887_s24, %s1880_s28 }
  0x7e   : > { %p1884_p1 = pneg %p1883_p13  ;;  %p1890_p9 = por %p1889_p2, %p1888_p11 }
  0x80   : > { %p1891_p0 = pnand %p1890_p9, %p1884_p1 }
  0x82   : > { %1894 = shalt.err (!%p1891_p0)
}
  0x83   : > { %1716 = dma.hbm_to_vmem [thread:$0]  (!%p2091_p8), %s2222_s19, 2048, %s2225_s17, %s424_s1, %s2497_s11, %s2497_s11, %s2496_s2  }
  0x84   : > { %p2498_p12 = scmp.ne.s32.totalorder %s2494_s16, 0 }
  0x85   : > { %s454_s25 = sand.u32 (!%p2498_p12), 1, %s1959_s18   ;;  %p2499_p7 = scmp.ne.s32.totalorder (!%p2498_p12), %s2488_s26, 0 }
  0x86   : > { %452 = sbr.rel (%p2498_p12) target bundleno = 1368 (0x558), region = 64  ;;  %s1312_s13 = sshll.u32 (!%p2498_p12), %s454_s25, 7 }
  0x87   : > { %s455_s15 = scalar_lea.sflag (!%p2498_p12), [#allocation4], %s454_s25  ;;  %s2257_s5 = scalar_lea.vmem (!%p2498_p12), [#allocation3], %s1312_s13 }
  0x8d   : > { %1938 = dma.done.wait (%p2499_p7), %s455_s15, 2048  }
  0x8e   : > { %1940 = vsyncadd (%p2499_p7), %s455_s15, 4294965248  ;;  %s463_s27 = sand.u32 1, %s2061_s21   ;;  %s2264_s2 = scalar_lea.vmem [#allocation6], %s1312_s13 }
  0x8f   : > { %s464_s30 = scalar_lea.sflag [#allocation7], %s463_s27 }
  0x90   : > { %1942 = dma.done.wait (%p2499_p7), %s464_s30, 4096  }
  0x91   : > { %1944 = vsyncadd (%p2499_p7), %s464_s30, 4294963200  ;;  %s2270_s16 = scalar_lea.vmem [#allocation8], %s1312_s13  ;;  %s482_s11 = scalar_lea.sflag [#allocation10], %s454_s25 }
  0x92   : > { %s2272_s19 = scalar_lea.vmem [#allocation9], %s1312_s13 }
  0x93   : > { %1946 = dma.done.wait (%p2499_p7), %s482_s11, 2048  }
  0x94   : > { %1948 = vsyncadd (%p2499_p7), %s482_s11, 4294965248  ;;  %p543_p8 = scmp.lt.s32.totalorder %s2061_s21, 1  ;;  %p1316_p3 = scmp.ne.s32.totalorder %s2061_s21, 0 }
  0x95   : > { %v556_v0 = vld [vmem:[%s2460_s3] sm:$0xff] (!%p1316_p3)  ;;  %v557_v1 = vld [vmem:[%s2460_s3 + $0x8] sm:$0xff] (!%p1316_p3) }
  0x96   : > { %s2280_s17 = scalar_select %p543_p8, %s2061_s21, 1 }
  0x97   : > { %555 = sbr.rel (%p1316_p3) target bundleno = 158 (0x9e), region = 84  ;;  %558 = vst [vmem:[#allocation2] sm:$0xff] (!%p1316_p3), %v556_v0  ;;  %559 = vst [vmem:[#allocation2 + $0x8] sm:$0xff] (!%p1316_p3), %v557_v1 }
  0x98   : > { %s545_s20 = scalar_lea.vmem %s2463_s6, %s2280_s17  ;;  %s548_s22 = scalar_lea.vmem %s2464_s7, %s2280_s17 }
  0x99   : > { %s551_s26 = scalar_lea.vmem %s2467_s10, %s2280_s17 }
  0x9e PF: > { %v2301_v2 = vld [vmem:[#allocation2] sm:$0xff]  ;;  %v2303_v3 = vld [vmem:[#allocation2 + $0x8] sm:$0xff]  ;;  %vm635_vm0 = vcmask 130048   ;;  %v1975_v6 = vmov 0   ;;  %s2500_s1 = sld [smem:[#allocation19_spill]]  ;;  %v584_v8 = vld [vmem:[%s2264_s2] sm:$0xff] }
  0x9f   : > { %v560_v4 = vld [vmem:[%s2457_s0] sm:$0xff]  ;;  %v1556_v5 = vpack.c.bf16 %v2303_v3, %v2301_v2  ;;  %1761 = vset.pattern.permute.xlu0 %v1975_v6  ;;  %v585_v9 = vld [vmem:[%s2264_s2 + $0x8] sm:$0xff]  ;;  %1762 = vset.pattern.permute.xlu1 %v1975_v6  ;;  %v587_v13 = vld [vmem:[%s2264_s2 + $0x18] sm:$0xff]  ;;  %s2501_s24 = sld [smem:[#allocation20_spill]]  ;;  %s1977_s17 = smov 64   ;;  %vm1133_vm1 = vcmask 261120  }
  0xa0   : > { %1413 = vmatprep.mubr.msk.f32.mxu0 %vm635_vm0, %v560_v4  ;;  %v586_v10 = vld [vmem:[%s2264_s2 + $0x10] sm:$0xff]  ;;  %v1560_v12 = vpack.c.bf16 %v585_v9, %v584_v8  ;;  %v561_v14 = vld [vmem:[%s2457_s0 + $0x8] sm:$0xff]  ;;  %v588_v16 = vld [vmem:[%s2264_s2 + $0x20] sm:$0xff]  ;;  %p1324_p5 = scmp.ne.s32.totalorder %s2061_s21, 1 }
  0xa1   : > { %1557 = vmatprep.subr.bf16.mxu0 %v1556_v5  ;;  %v1564_v15 = vpack.c.bf16 %v587_v13, %v586_v10  ;;  %v589_v17 = vld [vmem:[%s2264_s2 + $0x28] sm:$0xff]  ;;  %v590_v19 = vld [vmem:[%s2264_s2 + $0x30] sm:$0xff]  ;;  %v591_v20 = vld [vmem:[%s2264_s2 + $0x38] sm:$0xff] }
  0xa2   : > { %1559 = vmatpush3.bf16.msra.mxu0 %v1556_v5  ;;  %1561 = vmatprep.subr.bf16.mxu1 %v1560_v12  ;;  %v1568_v18 = vpack.c.bf16 %v589_v17, %v588_v16  ;;  %v1572_v21 = vpack.c.bf16 %v591_v20, %v590_v19  ;;  %v592_v22 = vld [vmem:[%s2264_s2 + $0x40] sm:$0xff]  ;;  %v593_v23 = vld [vmem:[%s2264_s2 + $0x48] sm:$0xff]  ;;  %v594_v25 = vld [vmem:[%s2264_s2 + $0x50] sm:$0xff] }
  0xa3   : > { %1563 = vmatpush3.bf16.msra.mxu1 %v1560_v12  ;;  %v1576_v24 = vpack.c.bf16 %v593_v23, %v592_v22  ;;  %v595_v26 = vld [vmem:[%s2264_s2 + $0x58] sm:$0xff]  ;;  %v596_v28 = vld [vmem:[%s2264_s2 + $0x60] sm:$0xff]  ;;  %v597_v29 = vld [vmem:[%s2264_s2 + $0x68] sm:$0xff] }
  0xa4   : > { %v562_v7 = vld [vmem:[%s2500_s1] sm:$0xff]  ;;  %v563_v11 = vld [vmem:[%s2500_s1 + $0x8] sm:$0xff]  ;;  %1565 = vmatprep.subr.bf16.mxu1 %v1564_v15  ;;  %v1580_v27 = vpack.c.bf16 %v595_v26, %v594_v25  ;;  %v1584_v30 = vpack.c.bf16 %v597_v29, %v596_v28  ;;  %v568_v34 = vld [vmem:[%s2257_s5] sm:$0xff] }
  0xa5   : > { %719 = vperm.xlu0 %1761, %v562_v7   ;;  %1414 = vmatmul.mubr.msk.f32.vlgmr.msra.gmra.mrb[0].mxu0 %vm635_vm0, %v561_v14  ;;  %v598_v31 = vld [vmem:[%s2264_s2 + $0x70] sm:$0xff]  ;;  %v599_v32 = vld [vmem:[%s2264_s2 + $0x78] sm:$0xff]  ;;  %v569_v35 = vld [vmem:[%s2257_s5 + $0x8] sm:$0xff] }
  0xa6   : > { %1518 = vmatprep.mubr.f32.mxu0 %v2301_v2  ;;  %v1588_v33 = vpack.c.bf16 %v599_v32, %v598_v31  ;;  %v2340_v36 = vpack.c.bf16 %v569_v35, %v568_v34  ;;  %v564_v37 = vld [vmem:[%s2501_s24] sm:$0xff]  ;;  %v618_v38 = vld [vmem:[%s2272_s19] sm:$0xff]  ;;  %v619_v39 = vld [vmem:[%s2272_s19 + $0x8] sm:$0xff] }
  0xa7   : > { %1567 = vmatpush3.bf16.msra.mxu1 %v1564_v15  ;;  %891 = vperm.xlu1 %1762, %v564_v37   ;;  %v620_v40 = vld [vmem:[%s2272_s19 + $0x10] sm:$0xff]  ;;  %v621_v41 = vld [vmem:[%s2272_s19 + $0x18] sm:$0xff]  ;;  %v1624_v43 = vpack.c.bf16 %v619_v39, %v618_v38  ;;  %v622_v45 = vld [vmem:[%s2272_s19 + $0x20] sm:$0xff] }
  0xa8   : > { %1569 = vmatprep.subr.bf16.mxu1 %v1568_v18  ;;  %v565_v42 = vld [vmem:[%s2501_s24 + $0x8] sm:$0xff]  ;;  %v1628_v44 = vpack.c.bf16 %v621_v41, %v620_v40  ;;  %v623_v46 = vld [vmem:[%s2272_s19 + $0x28] sm:$0xff]  ;;  %v624_v48 = vld [vmem:[%s2272_s19 + $0x30] sm:$0xff] }
  0xa9   : > { %724 = vperm.xlu0 %1761, %v563_v11   ;;  %1625 = vmatprep.subr.bf16.mxu0 %v1624_v43  ;;  %v1632_v47 = vpack.c.bf16 %v623_v46, %v622_v45  ;;  %v625_v49 = vld [vmem:[%s2272_s19 + $0x38] sm:$0xff]  ;;  %v626_v51 = vld [vmem:[%s2272_s19 + $0x40] sm:$0xff]  ;;  %v627_v52 = vld [vmem:[%s2272_s19 + $0x48] sm:$0xff] }
  0xaa   : > { %1627 = vmatpush3.bf16.msra.mxu0 %v1624_v43  ;;  %v1636_v50 = vpack.c.bf16 %v625_v49, %v624_v48  ;;  %v1640_v53 = vpack.c.bf16 %v627_v52, %v626_v51  ;;  %v628_v54 = vld [vmem:[%s2272_s19 + $0x50] sm:$0xff]  ;;  %v629_v55 = vld [vmem:[%s2272_s19 + $0x58] sm:$0xff]  ;;  %v630_v57 = vld [vmem:[%s2272_s19 + $0x60] sm:$0xff] }
  0xab   : > { %1571 = vmatpush3.bf16.msra.mxu1 %v1568_v18  ;;  %896 = vperm.xlu1 %1762, %v565_v42   ;;  %v1644_v56 = vpack.c.bf16 %v629_v55, %v628_v54  ;;  %v631_v58 = vld [vmem:[%s2272_s19 + $0x68] sm:$0xff]  ;;  %v632_v60 = vld [vmem:[%s2272_s19 + $0x70] sm:$0xff]  ;;  %v633_v61 = vld [vmem:[%s2272_s19 + $0x78] sm:$0xff] }
  0xac   : > { %1573 = vmatprep.subr.bf16.mxu1 %v1572_v21  ;;  %1629 = vmatprep.subr.bf16.mxu0 %v1628_v44  ;;  %v1648_v59 = vpack.c.bf16 %v631_v58, %v630_v57  ;;  %v1652_v62 = vpack.c.bf16 %v633_v61, %v632_v60  ;;  %v602_v63 = vld [vmem:[%s2270_s16] sm:$0xff]  ;;  %v603_v0 = vld [vmem:[%s2270_s16 + $0x8] sm:$0xff]  ;;  %v604_v4 = vld [vmem:[%s2270_s16 + $0x10] sm:$0xff] }
  0xad   : > { %v1656_v1 = vpack.c.bf16 %v603_v0, %v602_v63  ;;  %v605_v5 = vld [vmem:[%s2270_s16 + $0x18] sm:$0xff]  ;;  %v606_v7 = vld [vmem:[%s2270_s16 + $0x20] sm:$0xff]  ;;  %v607_v8 = vld [vmem:[%s2270_s16 + $0x28] sm:$0xff] }
  0xae   : > { %1631 = vmatpush3.bf16.msra.mxu0 %v1628_v44  ;;  %v1660_v6 = vpack.c.bf16 %v605_v5, %v604_v4  ;;  %v1664_v9 = vpack.c.bf16 %v607_v8, %v606_v7  ;;  %v608_v10 = vld [vmem:[%s2270_s16 + $0x30] sm:$0xff]  ;;  %v609_v11 = vld [vmem:[%s2270_s16 + $0x38] sm:$0xff]  ;;  %v610_v13 = vld [vmem:[%s2270_s16 + $0x40] sm:$0xff] }
  0xaf   : > { %1575 = vmatpush3.bf16.msra.mxu1 %v1572_v21  ;;  %1633 = vmatprep.subr.bf16.mxu0 %v1632_v47  ;;  %v1668_v12 = vpack.c.bf16 %v609_v11, %v608_v10  ;;  %v611_v14 = vld [vmem:[%s2270_s16 + $0x48] sm:$0xff]  ;;  %v612_v16 = vld [vmem:[%s2270_s16 + $0x50] sm:$0xff]  ;;  %v613_v17 = vld [vmem:[%s2270_s16 + $0x58] sm:$0xff] }
  0xb0   : > { %1577 = vmatprep.subr.bf16.mxu1 %v1576_v24  ;;  %v1672_v15 = vpack.c.bf16 %v611_v14, %v610_v13  ;;  %v1676_v18 = vpack.c.bf16 %v613_v17, %v612_v16  ;;  %v614_v19 = vld [vmem:[%s2270_s16 + $0x60] sm:$0xff]  ;;  %v615_v20 = vld [vmem:[%s2270_s16 + $0x68] sm:$0xff]  ;;  %v570_v22 = vld [vmem:[%s2257_s5 + $0x10] sm:$0xff] }
  0xb1   : > { %v1680_v21 = vpack.c.bf16 %v615_v20, %v614_v19  ;;  %v571_v23 = vld [vmem:[%s2257_s5 + $0x18] sm:$0xff]  ;;  %v572_v29 = vld [vmem:[%s2257_s5 + $0x20] sm:$0xff]  ;;  %v574_v32 = vld [vmem:[%s2257_s5 + $0x30] sm:$0xff] }
  0xb2   : > { %1635 = vmatpush3.bf16.msra.mxu0 %v1632_v47  ;;  %v1596_v28 = vpack.c.bf16 %v571_v23, %v570_v22  ;;  %v576_v35 = vld [vmem:[%s2257_s5 + $0x40] sm:$0xff]  ;;  %v577_v37 = vld [vmem:[%s2257_s5 + $0x48] sm:$0xff]  ;;  %v578_v39 = vld [vmem:[%s2257_s5 + $0x50] sm:$0xff] }
  0xb3   : > { %1579 = vmatpush3.bf16.msra.mxu1 %v1576_v24  ;;  %1637 = vmatprep.subr.bf16.mxu0 %v1636_v50  ;;  %v1608_v38 = vpack.c.bf16 %v577_v37, %v576_v35  ;;  %v579_v40 = vld [vmem:[%s2257_s5 + $0x58] sm:$0xff]  ;;  %v580_v41 = vld [vmem:[%s2257_s5 + $0x60] sm:$0xff]  ;;  %v581_v42 = vld [vmem:[%s2257_s5 + $0x68] sm:$0xff] }
  0xb4   : > { %1581 = vmatprep.subr.bf16.mxu1 %v1580_v27  ;;  %v1616_v43 = vpack.c.bf16 %v581_v42, %v580_v41  ;;  %v582_v44 = vld [vmem:[%s2257_s5 + $0x70] sm:$0xff]  ;;  %v583_v45 = vld [vmem:[%s2257_s5 + $0x78] sm:$0xff] }
  0xb5   : > { %v1620_v46 = vpack.c.bf16 %v583_v45, %v582_v44  ;;  %v616_v49 = vld [vmem:[%s2270_s16 + $0x70] sm:$0xff] }
  0xb6   : > { %1639 = vmatpush3.bf16.msra.mxu0 %v1636_v50  ;;  %v617_v50 = vld [vmem:[%s2270_s16 + $0x78] sm:$0xff]  ;;  %v1320_v55 = vld [vmem:[%s548_s22] ss:$0 sm:$0xff]  ;;  %s1976_s22 = smov 32  }
  0xb7   : > { %1583 = vmatpush3.bf16.msra.mxu1 %v1580_v27  ;;  %1641 = vmatprep.subr.bf16.mxu0 %v1640_v53  ;;  %v1684_v51 = vpack.c.bf16 %v617_v50, %v616_v49  ;;  %v1321_v4 = vld [vmem:[%s551_s26] ss:$0 sm:$0xff]  ;;  %s1978_s26 = smov 96  }
  0xb8   : > { %1585 = vmatprep.subr.bf16.mxu1 %v1584_v30 }
  0xba   : > { %1643 = vmatpush3.bf16.msra.mxu0 %v1640_v53  ;;  %v1319_v53 = vld [vmem:[%s545_s20] ss:$0 sm:$0xff] }
  0xbb   : > { %1587 = vmatpush3.bf16.msra.mxu1 %v1584_v30  ;;  %1645 = vmatprep.subr.bf16.mxu0 %v1644_v56  ;;  %v573_v30 = vld [vmem:[%s2257_s5 + $0x28] sm:$0xff] }
  0xbc   : > { %1589 = vmatprep.subr.bf16.mxu1 %v1588_v33  ;;  %v1600_v31 = vpack.c.bf16 %v573_v30, %v572_v29 }
  0xbe   : > { %1647 = vmatpush3.bf16.msra.mxu0 %v1644_v56 }
  0xbf   : > { %1591 = vmatpush3.bf16.msra.mxu1 %v1588_v33  ;;  %1649 = vmatprep.subr.bf16.mxu0 %v1648_v59  ;;  %v575_v33 = vld [vmem:[%s2257_s5 + $0x38] sm:$0xff] }
  0xc0   : > { %1593 = vmatprep.subr.bf16.mxu1 %v2340_v36  ;;  %v1604_v34 = vpack.c.bf16 %v575_v33, %v574_v32 }
  0xc2   : > { %1651 = vmatpush3.bf16.msra.mxu0 %v1648_v59 }
  0xc3   : > { %1653 = vmatprep.subr.bf16.mxu0 %v1652_v62 }
  0xc6   : > { %1655 = vmatpush3.bf16.msra.mxu0 %v1652_v62 }
  0xc7   : > { %1657 = vmatprep.subr.bf16.mxu0 %v1656_v1 }
  0xc9   : > { %1519 = vmatmul.mubr.f32.vlgmr.msra.gmra.mrb[2].mxu0 %v2303_v3 }
  0xca   : > { %1659 = vmatpush3.bf16.msra.mxu0 %v1656_v1 }
  0xcb   : > { %1661 = vmatprep.subr.bf16.mxu0 %v1660_v6 }
  0xce   : > { %1663 = vmatpush3.bf16.msra.mxu0 %v1660_v6 }
  0xcf   : > { %1665 = vmatprep.subr.bf16.mxu0 %v1664_v9 }
  0xd2   : > { %1667 = vmatpush3.bf16.msra.mxu0 %v1664_v9 }
  0xd3   : > { %1669 = vmatprep.subr.bf16.mxu0 %v1668_v12 }
  0xd6   : > { %1671 = vmatpush3.bf16.msra.mxu0 %v1668_v12 }
  0xd7   : > { %1673 = vmatprep.subr.bf16.mxu0 %v1672_v15 }
  0xda   : > { %1675 = vmatpush3.bf16.msra.mxu0 %v1672_v15 }
  0xdb   : > { %1677 = vmatprep.subr.bf16.mxu0 %v1676_v18 }
  0xde   : > { %1679 = vmatpush3.bf16.msra.mxu0 %v1676_v18 }
  0xdf   : > { %1681 = vmatprep.subr.bf16.mxu0 %v1680_v21 }
  0xe2   : > { %1683 = vmatpush3.bf16.msra.mxu0 %v1680_v21 }
  0xe3   : > { %1685 = vmatprep.subr.bf16.mxu0 %v1684_v51 }
  0xe6   : > { %1687 = vmatpush3.bf16.msra.mxu0 %v1684_v51 }
 0x124   : > { %v720_v24 = vpop.permute.xlu0 %719 }
 0x125   : > { %v727_v26 = vmul.f32 %v720_v24, %v2301_v2  ;;  %v885_v56 = vmul.f32 %v1319_v53, %v720_v24 }
 0x126   : > { %v892_v52 = vpop.permute.xlu1 %891 }
 0x127   : > { %v905_v61 = vmul.f32 %v1320_v55, %v892_v52 }
 0x128   : > { %v725_v47 = vpop.permute.xlu0 %724 }
 0x129   : > { %v728_v48 = vmul.f32 %v725_v47, %v2303_v3  ;;  %v886_v54 = vmul.f32 %v1319_v53, %v725_v47 }
 0x12a   : > { %v897_v57 = vpop.permute.xlu1 %896 }
 0x12b   : > { %v906_v63 = vmul.f32 %v1320_v55, %v897_v57 }
 0x178   : > { %v1415_v25 = vpop.f32.mrb[0].mxu0 }
 0x179   : > { %v708_v27 = vpop.f32.mrb[1].mxu0 }
 0x17a   : > { %1448 = vmatprep.mubr.f32.mxu1 %v708_v27 }
 0x17b   : > { %1449 = vmatmul.mubr.f32.vlgmr.msra.gmra.mrb[0].mxu1 %v1415_v25 }
 0x17c   : > { %1595 = vmatpush3.bf16.msra.mxu1 %v2340_v36  ;;  %1483 = vmatprep.mubr.f32.mxu1 %v727_v26  ;;  %v1612_v36 = vpack.c.bf16 %v579_v40, %v578_v39 }
 0x17d   : > { %1597 = vmatprep.subr.bf16.mxu1 %v1596_v28 }
 0x180   : > { %1599 = vmatpush3.bf16.msra.mxu1 %v1596_v28 }
 0x181   : > { %1601 = vmatprep.subr.bf16.mxu1 %v1600_v31 }
 0x184   : > { %1603 = vmatpush3.bf16.msra.mxu1 %v1600_v31 }
 0x185   : > { %1605 = vmatprep.subr.bf16.mxu1 %v1604_v34 }
 0x188   : > { %1607 = vmatpush3.bf16.msra.mxu1 %v1604_v34 }
 0x189   : > { %1609 = vmatprep.subr.bf16.mxu1 %v1608_v38 }
 0x18c   : > { %1611 = vmatpush3.bf16.msra.mxu1 %v1608_v38 }
 0x18d   : > { %1613 = vmatprep.subr.bf16.mxu1 %v1612_v36 }
 0x190   : > { %1615 = vmatpush3.bf16.msra.mxu1 %v1612_v36 }
 0x191   : > { %1617 = vmatprep.subr.bf16.mxu1 %v1616_v43 }
 0x194   : > { %1619 = vmatpush3.bf16.msra.mxu1 %v1616_v43 }
 0x195   : > { %1621 = vmatprep.subr.bf16.mxu1 %v1620_v46 }
 0x198   : > { %1623 = vmatpush3.bf16.msra.mxu1 %v1620_v46 }
 0x19b   : > { %1484 = vmatmul.mubr.f32.vlgmr.msra.gmra.mrb[0].mxu1 %v728_v48 }
 0x26e   : > { %v1485_v58 = vpop.f32.mrb[0].mxu1 }
 0x26f   : > { %v888_v59 = vadd.f32 %v1485_v58, %v886_v54  ;;  %v870_v60 = vpop.f32.mrb[1].mxu1 }
 0x270   : > { %v887_v62 = vadd.f32 %v885_v56, %v870_v60 }
 0x271   : > { %v908_v1 = vadd.f32 %v906_v63, %v888_v59 }
 0x272   : > { %v907_v0 = vadd.f32 %v905_v61, %v887_v62 }
 0x274   : > { %1553 = vmatprep.mubr.f32.mxu0 %v907_v0 }
 0x275   : > { %1554 = vmatmul.mubr.f32.vlgmr.msra.gmra.mrb[2].mxu0 %v908_v1 }
 0x348   : > { %v1555_v5 = vpop.f32.mrb[2].mxu0 }
 0x349   : > { %v1066_v6 = vadd.f32 %v1555_v5, %v1321_v4  ;;  %v1050_v7 = vpop.f32.mrb[3].mxu0 }
 0x34a   : > { %v1065_v8 = vadd.f32 %v1321_v4, %v1050_v7 }
 0x34b   : > { %1083 = vrot.lane.b32.xlu1 %v1066_v6, %s1976_s22  ;;  %v1323_v9 = vmul.f32 -1.442695, %v1066_v6 }
 0x34c   : > { %1081 = vrot.lane.b32.xlu0 %v1065_v8, %s1976_s22  ;;  %v1322_v10 = vmul.f32 -1.442695, %v1065_v8 }
 0x34d   : > { %1763 = vpow2.f32 %v1323_v9 }
 0x34e   : > { %1765 = vpow2.f32 %v1322_v10 }
 0x357   : > { %v1764_v11 = vpop.eup %1763 }
 0x358   : > { %v1766_v12 = vpop.eup %1765  ;;  %v1074_v13 = vadd.f32 1.0, %v1764_v11 }
 0x359   : > { %v1073_v14 = vadd.f32 1.0, %v1766_v12 }
 0x35a   : > { %1767 = vrcp.f32 %v1074_v13 }
 0x35b   : > { %1769 = vrcp.f32 %v1073_v14 }
 0x364   : > { %v1768_v15 = vpop.eup %1767 }
 0x365   : > { %v1770_v17 = vpop.eup %1769  ;;  %v1102_v29 = vsub.f32 1.0, %v1768_v15 }
 0x366   : > { %v1101_v30 = vsub.f32 1.0, %v1770_v17 }
 0x3bd   : > { %v1084_v16 = vpop.permute.xlu1 %1083 }
 0x3be   : > { %v1088_v18 = vmul.f32 %v1768_v15, %v1084_v16  ;;  %v1082_v19 = vpop.permute.xlu0 %1081 }
 0x3bf   : > { %v1087_v20 = vmul.f32 %v1770_v17, %v1082_v19 }
 0x3c0   : > { %1093 = vrot.lane.b32.xlu1 %v1088_v18, %s1977_s17 }
 0x3c1   : > { %1091 = vrot.lane.b32.xlu0 %v1087_v20, %s1977_s17 }
 0x432   : > { %v1094_v21 = vpop.permute.xlu1 %1093 }
 0x433   : > { %v1098_v22 = vadd.f32 %v1094_v21, %v1066_v6  ;;  %v1092_v23 = vpop.permute.xlu0 %1091 }
 0x434   : > { %v1097_v24 = vadd.f32 %v1092_v23, %v1065_v8 }
 0x435   : > { %1771 = vtanh.f32 %v1098_v22 }
 0x436   : > { %1773 = vtanh.f32 %v1097_v24 }
 0x43f   : > { %v1772_v25 = vpop.eup %1771 }
 0x440   : > { %v1774_v26 = vpop.eup %1773  ;;  %1107 = vrot.lane.b32.xlu1 %v1772_v25, %s1978_s26 }
 0x441   : > { %1105 = vrot.lane.b32.xlu0 %v1774_v26, %s1978_s26 }
 0x444   : > { %1117 = vrot.lane.b32.xlu1 %v2303_v3, %s1976_s22 }
 0x445   : > { %1115 = vrot.lane.b32.xlu0 %v2301_v2, %s1976_s22 }
 0x4b2   : > { %v1108_v27 = vpop.permute.xlu1 %1107 }
 0x4b3   : > { %v1106_v28 = vpop.permute.xlu0 %1105  ;;  %v1112_v32 = vmul.f32 %v1108_v27, %v1102_v29 }
 0x4b4   : > { %v1111_v35 = vmul.f32 %v1106_v28, %v1101_v30 }
 0x4b6   : > { %v1118_v31 = vpop.permute.xlu1 %1117 }
 0x4b7   : > { %v1122_v33 = vmul.f32 %v1768_v15, %v1118_v31  ;;  %v1116_v34 = vpop.permute.xlu0 %1115 }
 0x4b8   : > { %v1121_v37 = vmul.f32 %v1770_v17, %v1116_v34 }
 0x4b9   : > { %v1124_v38 = vadd.f32 %v1122_v33, %v1112_v32 }
 0x4ba   : > { %v1123_v39 = vadd.f32 %v1121_v37, %v1111_v35 }
 0x4bb   : > { %1129 = vrot.lane.b32.xlu1 %v1124_v38, %s1978_s26 }
 0x4bc   : > { %1127 = vrot.lane.b32.xlu0 %v1123_v39, %s1978_s26 }
 0x529   : > { %1139 = sbr.rel (%p1324_p5) target bundleno = 1336 (0x538), region = 88 }
 0x52d   : > { %v1130_v40 = vpop.permute.xlu1 %1129 }
 0x52e   : > { %1135 = vst.msk [vmem:[#allocation2 + $0x8] sm:$0xff] %vm1133_vm1, %v1130_v40  ;;  %v1128_v3 = vpop.permute.xlu0 %1127 }
 0x52f   : > { %1134 = vst.msk [vmem:[#allocation2] sm:$0xff] %vm1133_vm1, %v1128_v3 }
 0x535   : > { %v1141_v36 = vld [vmem:[#allocation2 + $0x8] sm:$0xff] }
 0x536   : > { %v1140_v2 = vld [vmem:[#allocation2] sm:$0xff]  ;;  %1143 = vst [vmem:[#allocation11 + $0x8] sm:$0xff] %v1141_v36 }
 0x537   : > { %1142 = vst [vmem:[#allocation11] sm:$0xff] %v1140_v2 }
 0x538 PF: > { %p1718_p6 = scmp.eq.s32.totalorder %s2061_s21, 1  ;;  %s1979_s27 = smov [#allocation11]  }
 0x539   : > { %s1150_s30 = sshll.u32 %s1979_s27, 4  ;;  %s1151_s30 = int_to_ptr.vmem [resolvable:$true] %s1150_s30 }
 0x53a   : > { %s1895_s11 = scalar_lea.vmem %s1151_s30, 256  ;;  %p1902_p1 = scmp.lt.s32.totalorder %s1151_s30, %s1151_s30 }
 0x53b   : > { %p1896_p10 = scmp.ne.s32.totalorder %s1151_s30, %s1895_s11  ;;  %p1903_p11 = scmp.lt.s32.totalorder %s1895_s11, %s1895_s11 }
 0x53d   : > { %p1897_p4 = pnand %p1896_p10, %p1718_p6  ;;  %p1904_p2 = por %p1903_p11, %p1902_p1 }
 0x53f   : > { %p1898_p13 = pneg %p1897_p4 }
 0x541   : > { %p1905_p9 = pnand %p1904_p2, %p1898_p13 }
 0x543   : > { %1908 = shalt.err (!%p1905_p9)
}
 0x544   : > { %s2502_s29 = sld [smem:[#allocation23_spill]] }
 0x54a   : > { %s1909_s28 = scalar_lea.hbm %s2502_s29, 256 }
 0x54b   : > { %p1910_p0 = scmp.ne.s32.totalorder %s2502_s29, %s1909_s28  ;;  %p1915_p8 = scmp.lt.u32.totalorder %s1909_s28, %s2502_s29 }
 0x54d   : > { %p1911_p12 = pnand %p1910_p0, %p1718_p6 }
 0x54f   : > { %p1912_p7 = pneg %p1911_p12 }
 0x551   : > { %p1917_p3 = pnand %p1915_p8, %p1912_p7 }
 0x553   : > { %1920 = shalt.err (!%p1917_p3)
}
 0x554   : > { %s1980_s19 = smov 128   ;;  %s1981_s5 = smov 8  }
 0x555   : > { %1701 = dma.vmem_to_hbm [thread:$0]  (%p1718_p6), %s1151_s30, 256, %s2502_s29, [#allocation5], %s1980_s19, %s1980_s19, %s1981_s5  }
 0x556   : > { %1950 = dma.done.wait (%p1718_p6), [#allocation5], 256  }
 0x557   : > { %1952 = vsyncadd (%p1718_p6), [#allocation5], 4294967040 }
 0x558 PF: > { %s2503_s20 = sld [smem:[#allocation17_spill]]  ;;  %s2504_s16 = sld [smem:[#allocation16_spill]] }
 0x559   : > { %s2505_s19 = sld [smem:[#allocation18_spill]]  ;;  %s2506_s17 = smov %s1959_s18 }
 0x55e   : > { %p28_p5 = scmp.ge.s32.totalorder %s2503_s20, 4   ;;  %s2507_s18 = smov %s2504_s16 }
 0x560   :  { %30 = sbr.rel (!%p28_p5) target bundleno = 14 (0xe), region = 155 }
 0x567   :  { %1166 = vsyncpa [#allocation4], 1 }
 0x568   :  { %1168 = vsyncpa [#allocation4 + $0x1], 1 }
 0x569   :  { %1169 = vsyncpa [#allocation7], 1 }
 0x56a   :  { %1171 = vsyncpa [#allocation7 + $0x1], 1 }
 0x56b   :  { %1172 = vsyncpa [#allocation10], 1 }
 0x56c   :  { %1174 = vsyncpa [#allocation10 + $0x1], 1 }
 0x56d   :  { %1175 = vsyncpa [#allocation5], 1 }
 0x56e   :  { %1177 = vsyncpa [#allocation5 + $0x1], 1 }

</bundles_post_ra>
